<compile_context>
chip_gen: v5e
topology: v5e:2x2
jax: 0.10.0
libtpu: 0.0.40
codegen_flags: <defaults>
</compile_context>

<pallas_src>
import functools

import jax
import jax.numpy as jnp
from jax import lax
from jax.experimental import pallas as pl
from jax.experimental.pallas import tpu as pltpu

_LANE = 128  # NOTE: at real widths (>=256) pad to 256 on v6e/v7x for full MXU width.


def _round_up(n, m):
    return ((n + m - 1) // m) * m


def _pad2(a, shape):
    # Zero padding is load-bearing: padded gamma/beta/weight columns must stay
    # zero so padded activation columns remain exactly zero through BN/ReLU.
    pads = [(0, t - s) for s, t in zip(a.shape, shape)]
    return jnp.pad(a, pads)


def extract_patches(x, p):
    """[B, C, H, W] -> [B*(H//p)*(W//p), C*p*p], patch flatten order (C, ph, pw)."""
    B, C, H, W = x.shape
    x = x.reshape(B, C, H // p, p, W // p, p)
    x = x.transpose(0, 2, 4, 1, 3, 5)          # [B, H//p, W//p, C, p, p]
    return x.reshape(B * (H // p) * (W // p), C * p * p)


def _make_perms(args, B, P):
    keys = jax.random.split(jax.random.PRNGKey(args["shuffle_seed"]), B)
    return jax.vmap(lambda k: jax.random.permutation(k, P))(keys)   # [B, P]


# ------------------------------- fused kernel -------------------------------

def _fused_encoder_kernel(*refs, depth, tile_pos, matmul_dtype):
    if depth > 0:
        (patches_ref, w0_ref, b0_ref,
         dw_ref, dg_ref, dbt_ref,
         pos_ref, wmix_ref, bmix_ref, out_ref) = refs
    else:
        (patches_ref, w0_ref, b0_ref,
         pos_ref, wmix_ref, bmix_ref, out_ref) = refs
        dw_ref = dg_ref = dbt_ref = None

    eps = 1e-5
    md = matmul_dtype

    # --- stage 1: patchify conv as matmul + bias + ReLU ----------------------
    h = jnp.dot(patches_ref[...].astype(md), w0_ref[...].astype(md),
                preferred_element_type=jnp.float32)
    h = jnp.maximum(h + b0_ref[...], 0.0)

    # --- stage 2: depth x {1x1 conv -> BatchNorm2d(batch stats) -> ReLU} -----
    # Conv bias omitted (exactly cancelled by the BN mean subtraction).
    # Fused BN: one y*y pass + two column reductions + one FMA-style pass.
    for d in range(depth):
        y = jnp.dot(h.astype(md), dw_ref[d].astype(md),
                    preferred_element_type=jnp.float32)
        m1 = jnp.mean(y, axis=0, keepdims=True)
        m2 = jnp.mean(y * y, axis=0, keepdims=True)
        var = jnp.maximum(m2 - m1 * m1, 0.0)
        scale = dg_ref[d] * lax.rsqrt(var + eps)       # [1, Hp]
        shift = dbt_ref[d] - m1 * scale                # [1, Hp]
        h = jnp.maximum(y * scale + shift, 0.0)

    # --- stage 3: (+ pos_embedding) -> ReLU -> Linear -------------------------
    pos = pos_ref[...]
    if tile_pos > 1:                                   # pos passed as [P, Hp]
        pos = jnp.concatenate([pos] * tile_pos, axis=0)
    a = jnp.maximum(h + pos, 0.0)
    out = jnp.dot(a.astype(md), wmix_ref[...].astype(md),
                  preferred_element_type=jnp.float32) + bmix_ref[...]
    out_ref[...] = out.astype(out_ref.dtype)
    # (Pixel shuffle already applied upstream via permuted patch / pos rows.)


# --------------------------- one-time parameter prep --------------------------

def prepare_params(params, args):
    """Pad / stack weights once (hoisted out of the per-forward path)."""
    p = args["private_kernel_size"]
    K, hidden = params["w0"].shape
    out_dim = params["w_mix"].shape[1]
    depth = len(params["depth_layers"])
    P = params["pos"].shape[0]

    Kp = _round_up(K, _LANE)
    Hp = _round_up(hidden, _LANE)
    Op = _round_up(out_dim, _LANE)

    prep = {
        "dims": dict(K=K, hidden=hidden, out_dim=out_dim, depth=depth,
                     Kp=Kp, Hp=Hp, Op=Op, P=P, patch=p),
        "w0": _pad2(params["w0"], (Kp, Hp)),
        "b0": _pad2(params["b0"], (1, Hp)),
        "pos": _pad2(params["pos"], (P, Hp)),
        "w_mix": _pad2(params["w_mix"], (Hp, Op)),
        "b_mix": _pad2(params["b_mix"], (1, Op)),
    }
    if depth > 0:
        # Per-layer conv bias `b` intentionally not shipped to the kernel:
        # it is exactly cancelled by the BatchNorm mean subtraction.
        prep["dw"] = jnp.stack([_pad2(l["w"], (Hp, Hp)) for l in params["depth_layers"]])
        prep["dg"] = jnp.stack([_pad2(l["gamma"], (1, Hp)) for l in params["depth_layers"]])
        prep["dbt"] = jnp.stack([_pad2(l["beta"], (1, Hp)) for l in params["depth_layers"]])
    return prep


# ------------------------------ forward wrapper ------------------------------

def private_encoder_forward(prep, x, args, matmul_in_bf16=None):
    d = prep["dims"]
    p, depth = d["patch"], d["depth"]
    B, _, H, W = x.shape
    assert H % p == 0 and W % p == 0
    P = (H // p) * (W // p)
    assert P == d["P"]
    M = B * P
    Kp, Hp, Op = d["Kp"], d["Hp"], d["Op"]

    if matmul_in_bf16 is None:
        # bf16 operands (f32 accumulation) are the big MXU lever on v6e/v7x at
        # real widths; toy widths keep pure f32 semantics.
        matmul_in_bf16 = d["hidden"] >= 256
    md = jnp.bfloat16 if matmul_in_bf16 else jnp.float32

    patches = _pad2(extract_patches(x, p), (M, Kp))                   # [M, Kp]

    apply_shuffle = not args["remove_pixel_shuffle"]
    if apply_shuffle:
        # Apply the per-batch pixel shuffle UPSTREAM: permute the patch rows and
        # the matching pos rows.  Every kernel stage is row-wise and the BN
        # statistics are permutation-invariant, so the kernel output is already
        # in shuffled order -- zero in-kernel shuffle work.
        perms = _make_perms(args, B, P)                               # [B, P]
        flat = (perms + jnp.arange(B)[:, None] * P).reshape(-1)
        patches = jnp.take(patches, flat, axis=0)
        pos_in = jnp.take(prep["pos"], perms.reshape(-1), axis=0)     # [M, Hp]
        tile_pos = 1
    elif B > 1 and P % 8 == 0:
        pos_in = prep["pos"]                                          # [P, Hp], broadcast in-kernel
        tile_pos = B
    else:
        pos_in = jnp.tile(prep["pos"], (B, 1))                        # [M, Hp]
        tile_pos = 1

    inputs = [patches, prep["w0"], prep["b0"]]
    in_specs = [
        pl.BlockSpec((M, Kp), lambda i: (0, 0)),
        pl.BlockSpec((Kp, Hp), lambda i: (0, 0)),
        pl.BlockSpec((1, Hp), lambda i: (0, 0)),
    ]
    if depth > 0:   # depth tensors only DMA'd when they exist
        inputs += [prep["dw"], prep["dg"], prep["dbt"]]
        in_specs += [
            pl.BlockSpec((depth, Hp, Hp), lambda i: (0, 0, 0)),
            pl.BlockSpec((depth, 1, Hp), lambda i: (0, 0, 0)),
            pl.BlockSpec((depth, 1, Hp), lambda i: (0, 0, 0)),
        ]
    inputs += [pos_in, prep["w_mix"], prep["b_mix"]]
    in_specs += [
        pl.BlockSpec(tuple(pos_in.shape), lambda i: (0, 0)),
        pl.BlockSpec((Hp, Op), lambda i: (0, 0)),
        pl.BlockSpec((1, Op), lambda i: (0, 0)),
    ]

    kern = functools.partial(_fused_encoder_kernel, depth=depth,
                             tile_pos=tile_pos, matmul_dtype=md)

    out = pl.pallas_call(
        kern,
        out_shape=jax.ShapeDtypeStruct((M, Op), jnp.float32),
        grid_spec=pltpu.PrefetchScalarGridSpec(
            num_scalar_prefetch=0,
            grid=(1,),  # single block: BN needs global batch statistics over all rows
            in_specs=in_specs,
            out_specs=pl.BlockSpec((M, Op), lambda i: (0, 0)),
        ),
        compiler_params=pltpu.CompilerParams(
            dimension_semantics=("arbitrary",),
            vmem_limit_bytes=48 * 1024 * 1024,   # <= ~56 MiB keeps the resident design viable on v7x
        ),
    )(*inputs)

    return out[:, :d["out_dim"]].reshape(B, P, d["out_dim"])


# ------------------------------ reference (JAX) ------------------------------

def reference_forward(params, x, args):
    """Plain-JAX reference with the original module semantics (validation only)."""
    p = args["private_kernel_size"]
    B, _, H, W = x.shape
    P = (H // p) * (W // p)
    patches = extract_patches(x, p)
    h = jnp.maximum(patches @ params["w0"] + params["b0"], 0.0)
    for layer in params["depth_layers"]:
        y = h @ layer["w"] + layer["b"]
        mean = jnp.mean(y, axis=0, keepdims=True)
        var = jnp.mean(jnp.square(y - mean), axis=0, keepdims=True)
        y = (y - mean) * lax.rsqrt(var + 1e-5)
        h = jnp.maximum(layer["gamma"] * y + layer["beta"], 0.0)
    a = jnp.maximum(h.reshape(B, P, -1) + params["pos"][None], 0.0)
    out = a @ params["w_mix"] + params["b_mix"]
    if not args["remove_pixel_shuffle"]:
        perms = _make_perms(args, B, P)
        out = jnp.take_along_axis(out, perms[:, :, None], axis=1)
    return out


# --------------------------------- init --------------------------------------

def init_params(key, args, width_factor=1):
    C_in = args["num_chan"]
    p = args["private_kernel_size"]
    hidden = args["hidden_dim"] * width_factor
    out_dim = args["hidden_dim"]
    P = (args["img_size"][0] // p) ** 2
    K = C_in * p * p

    ks = jax.random.split(key, 4 + 4 * args["private_depth"] + 3)
    i = iter(range(len(ks)))
    params = {
        "w0": 0.1 * jax.random.normal(ks[next(i)], (K, hidden), jnp.float32),
        "b0": 0.1 * jax.random.normal(ks[next(i)], (1, hidden), jnp.float32),
        "depth_layers": [],
        "pos": jax.random.normal(ks[next(i)], (P, hidden), jnp.float32),
        "w_mix": 0.1 * jax.random.normal(ks[next(i)], (hidden, out_dim), jnp.float32),
    }
    for _ in range(args["private_depth"]):
        params["depth_layers"].append({
            "w": 0.1 * jax.random.normal(ks[next(i)], (hidden, hidden), jnp.float32),
            "b": 0.1 * jax.random.normal(ks[next(i)], (1, hidden), jnp.float32),
            "gamma": 1.0 + 0.1 * jax.random.normal(ks[next(i)], (1, hidden), jnp.float32),
            "beta": 0.1 * jax.random.normal(ks[next(i)], (1, hidden), jnp.float32),
        })
    params["b_mix"] = 0.1 * jax.random.normal(ks[next(i)], (1, out_dim), jnp.float32)
    return params


if __name__ == "__main__":
    args = {
        "num_chan": 4,
        "private_kernel_size": 4,
        "hidden_dim": 32,
        "img_size": (16, 16),
        "private_depth": 2,
        "remove_pixel_shuffle": False,
        "shuffle_seed": 123,
    }
    B = 2

    key = jax.random.PRNGKey(0)
    k_param, k_x = jax.random.split(key)
    params = init_params(k_param, args)
    prep = prepare_params(params, args)          # one-time weight padding/stacking
    x = jax.random.normal(k_x, (B, args["num_chan"], *args["img_size"]), jnp.float32)

    P = (args["img_size"][0] // args["private_kernel_size"]) ** 2

    # Config A: pixel shuffle ON, depth=2 (matches the module defaults).
    out = jax.block_until_ready(private_encoder_forward(prep, x, args))
    ref = jax.block_until_ready(reference_forward(params, x, args))
    assert out.shape == (B, P, args["hidden_dim"]), out.shape
    assert bool(jnp.all(jnp.isfinite(out)))
    assert bool(jnp.allclose(out, ref, atol=1e-2, rtol=1e-2))

    # Config B: pixel shuffle OFF (exercises the [P, Hp] broadcast-pos path).
    args_ns = dict(args, remove_pixel_shuffle=True)
    out2 = jax.block_until_ready(private_encoder_forward(prep, x, args_ns))
    ref2 = reference_forward(params, x, args_ns)
    assert bool(jnp.allclose(out2, ref2, atol=1e-2, rtol=1e-2))

    # Config C: private_depth=0 (exercises the conditional depth-input wiring).
    args_d0 = dict(args, private_depth=0)
    params_d0 = init_params(k_param, args_d0)
    prep_d0 = prepare_params(params_d0, args_d0)
    out3 = jax.block_until_ready(private_encoder_forward(prep_d0, x, args_d0))
    ref3 = reference_forward(params_d0, x, args_d0)
    assert bool(jnp.allclose(out3, ref3, atol=1e-2, rtol=1e-2))

    print("KERNEL_OK")
</pallas_src>

<mosaic_0001>
module attributes {stable_mosaic.version = 11 : i64} {
  func.func @_fused_encoder_kernel(%arg0: i32, %arg1: memref<32x128xf32, #tpu.memory_space<vmem>>, %arg2: memref<128x128xf32, #tpu.memory_space<vmem>>, %arg3: memref<1x128xf32, #tpu.memory_space<vmem>>, %arg4: memref<2x128x128xf32, #tpu.memory_space<vmem>>, %arg5: memref<2x1x128xf32, #tpu.memory_space<vmem>>, %arg6: memref<2x1x128xf32, #tpu.memory_space<vmem>>, %arg7: memref<32x128xf32, #tpu.memory_space<vmem>>, %arg8: memref<128x128xf32, #tpu.memory_space<vmem>>, %arg9: memref<1x128xf32, #tpu.memory_space<vmem>>, %arg10: memref<32x128xf32, #tpu.memory_space<vmem>>) attributes {dimension_semantics = [#tpu.dimension_semantics<arbitrary>], iteration_bounds = array<i64: 1>, scalar_prefetch = 0 : i64, scratch_operands = 0 : i64, tpu.core_type = #tpu.core_type<tc>, window_params = [{pipeline_mode = #tpu.pipeline_mode<synchronous>, transform_indices = @transform_0, window_bounds = array<i64: 32, 128>}, {pipeline_mode = #tpu.pipeline_mode<synchronous>, transform_indices = @transform_1, window_bounds = array<i64: 128, 128>}, {pipeline_mode = #tpu.pipeline_mode<synchronous>, transform_indices = @transform_2, window_bounds = array<i64: 1, 128>}, {pipeline_mode = #tpu.pipeline_mode<synchronous>, transform_indices = @transform_3, window_bounds = array<i64: 2, 128, 128>}, {pipeline_mode = #tpu.pipeline_mode<synchronous>, transform_indices = @transform_4, window_bounds = array<i64: 2, 1, 128>}, {pipeline_mode = #tpu.pipeline_mode<synchronous>, transform_indices = @transform_5, window_bounds = array<i64: 2, 1, 128>}, {pipeline_mode = #tpu.pipeline_mode<synchronous>, transform_indices = @transform_6, window_bounds = array<i64: 32, 128>}, {pipeline_mode = #tpu.pipeline_mode<synchronous>, transform_indices = @transform_7, window_bounds = array<i64: 128, 128>}, {pipeline_mode = #tpu.pipeline_mode<synchronous>, transform_indices = @transform_8, window_bounds = array<i64: 1, 128>}, {pipeline_mode = #tpu.pipeline_mode<synchronous>, transform_indices = @transform_9, window_bounds = array<i64: 32, 128>}]} {
    %c0 = arith.constant 0 : index
    %c0_0 = arith.constant 0 : index
    %0 = vector.load %arg1[%c0, %c0_0] : memref<32x128xf32, #tpu.memory_space<vmem>>, vector<32x128xf32>
    %c0_1 = arith.constant 0 : index
    %c0_2 = arith.constant 0 : index
    %1 = vector.load %arg2[%c0_1, %c0_2] : memref<128x128xf32, #tpu.memory_space<vmem>>, vector<128x128xf32>
    %cst = arith.constant dense<0.000000e+00> : vector<32x128xf32>
    %2 = tpu.matmul %0, %1, %cst {dimension_numbers = #tpu.dot_dimension_numbers<[1], [0], [0], [1], [0, 0, 1, 1], [], []>} : vector<32x128xf32>, vector<128x128xf32>, vector<32x128xf32> -> vector<32x128xf32>
    %c0_3 = arith.constant 0 : index
    %c0_4 = arith.constant 0 : index
    %3 = vector.load %arg3[%c0_3, %c0_4] : memref<1x128xf32, #tpu.memory_space<vmem>>, vector<1x128xf32>
    %4 = vector.broadcast %3 : vector<1x128xf32> to vector<32x128xf32>
    %5 = arith.addf %2, %4 : vector<32x128xf32>
    %cst_5 = arith.constant 0.000000e+00 : f32
    %6 = vector.broadcast %cst_5 : f32 to vector<32x128xf32>
    %7 = arith.maximumf %5, %6 : vector<32x128xf32>
    %c0_6 = arith.constant 0 : index
    %c0_7 = arith.constant 0 : index
    %c0_8 = arith.constant 0 : index
    %8 = vector.load %arg4[%c0_6, %c0_7, %c0_8] : memref<2x128x128xf32, #tpu.memory_space<vmem>>, vector<1x128x128xf32>
    %9 = vector.shape_cast %8 : vector<1x128x128xf32> to vector<128x128xf32>
    %cst_9 = arith.constant dense<0.000000e+00> : vector<32x128xf32>
    %10 = tpu.matmul %7, %9, %cst_9 {dimension_numbers = #tpu.dot_dimension_numbers<[1], [0], [0], [1], [0, 0, 1, 1], [], []>} : vector<32x128xf32>, vector<128x128xf32>, vector<32x128xf32> -> vector<32x128xf32>
    %cst_10 = arith.constant dense<0.000000e+00> : vector<128xf32>
    %11 = vector.multi_reduction <add>, %10, %cst_10 [0] : vector<32x128xf32> to vector<128xf32>
    %12 = vector.shape_cast %11 : vector<128xf32> to vector<1x128xf32>
    %cst_11 = arith.constant 3.200000e+01 : f32
    %13 = vector.broadcast %cst_11 : f32 to vector<1x128xf32>
    %14 = arith.divf %12, %13 : vector<1x128xf32>
    %15 = arith.mulf %10, %10 : vector<32x128xf32>
    %cst_12 = arith.constant dense<0.000000e+00> : vector<128xf32>
    %16 = vector.multi_reduction <add>, %15, %cst_12 [0] : vector<32x128xf32> to vector<128xf32>
    %17 = vector.shape_cast %16 : vector<128xf32> to vector<1x128xf32>
    %cst_13 = arith.constant 3.200000e+01 : f32
    %18 = vector.broadcast %cst_13 : f32 to vector<1x128xf32>
    %19 = arith.divf %17, %18 : vector<1x128xf32>
    %20 = arith.mulf %14, %14 : vector<1x128xf32>
    %21 = arith.subf %19, %20 : vector<1x128xf32>
    %cst_14 = arith.constant 0.000000e+00 : f32
    %22 = vector.broadcast %cst_14 : f32 to vector<1x128xf32>
    %23 = arith.maximumf %21, %22 : vector<1x128xf32>
    %c0_15 = arith.constant 0 : index
    %c0_16 = arith.constant 0 : index
    %c0_17 = arith.constant 0 : index
    %24 = vector.load %arg5[%c0_15, %c0_16, %c0_17] : memref<2x1x128xf32, #tpu.memory_space<vmem>>, vector<1x1x128xf32>
    %25 = vector.shape_cast %24 : vector<1x1x128xf32> to vector<1x128xf32>
    %cst_18 = arith.constant 9.99999974E-6 : f32
    %26 = vector.broadcast %cst_18 : f32 to vector<1x128xf32>
    %27 = arith.addf %23, %26 : vector<1x128xf32>
    %28 = math.rsqrt %27 : vector<1x128xf32>
    %29 = arith.mulf %25, %28 : vector<1x128xf32>
    %c0_19 = arith.constant 0 : index
    %c0_20 = arith.constant 0 : index
    %c0_21 = arith.constant 0 : index
    %30 = vector.load %arg6[%c0_19, %c0_20, %c0_21] : memref<2x1x128xf32, #tpu.memory_space<vmem>>, vector<1x1x128xf32>
    %31 = vector.shape_cast %30 : vector<1x1x128xf32> to vector<1x128xf32>
    %32 = arith.mulf %14, %29 : vector<1x128xf32>
    %33 = arith.subf %31, %32 : vector<1x128xf32>
    %34 = vector.broadcast %29 : vector<1x128xf32> to vector<32x128xf32>
    %35 = arith.mulf %10, %34 : vector<32x128xf32>
    %36 = vector.broadcast %33 : vector<1x128xf32> to vector<32x128xf32>
    %37 = arith.addf %35, %36 : vector<32x128xf32>
    %cst_22 = arith.constant 0.000000e+00 : f32
    %38 = vector.broadcast %cst_22 : f32 to vector<32x128xf32>
    %39 = arith.maximumf %37, %38 : vector<32x128xf32>
    %c1 = arith.constant 1 : index
    %c0_23 = arith.constant 0 : index
    %c0_24 = arith.constant 0 : index
    %40 = vector.load %arg4[%c1, %c0_23, %c0_24] : memref<2x128x128xf32, #tpu.memory_space<vmem>>, vector<1x128x128xf32>
    %41 = vector.shape_cast %40 : vector<1x128x128xf32> to vector<128x128xf32>
    %cst_25 = arith.constant dense<0.000000e+00> : vector<32x128xf32>
    %42 = tpu.matmul %39, %41, %cst_25 {dimension_numbers = #tpu.dot_dimension_numbers<[1], [0], [0], [1], [0, 0, 1, 1], [], []>} : vector<32x128xf32>, vector<128x128xf32>, vector<32x128xf32> -> vector<32x128xf32>
    %cst_26 = arith.constant dense<0.000000e+00> : vector<128xf32>
    %43 = vector.multi_reduction <add>, %42, %cst_26 [0] : vector<32x128xf32> to vector<128xf32>
    %44 = vector.shape_cast %43 : vector<128xf32> to vector<1x128xf32>
    %cst_27 = arith.constant 3.200000e+01 : f32
    %45 = vector.broadcast %cst_27 : f32 to vector<1x128xf32>
    %46 = arith.divf %44, %45 : vector<1x128xf32>
    %47 = arith.mulf %42, %42 : vector<32x128xf32>
    %cst_28 = arith.constant dense<0.000000e+00> : vector<128xf32>
    %48 = vector.multi_reduction <add>, %47, %cst_28 [0] : vector<32x128xf32> to vector<128xf32>
    %49 = vector.shape_cast %48 : vector<128xf32> to vector<1x128xf32>
    %cst_29 = arith.constant 3.200000e+01 : f32
    %50 = vector.broadcast %cst_29 : f32 to vector<1x128xf32>
    %51 = arith.divf %49, %50 : vector<1x128xf32>
    %52 = arith.mulf %46, %46 : vector<1x128xf32>
    %53 = arith.subf %51, %52 : vector<1x128xf32>
    %cst_30 = arith.constant 0.000000e+00 : f32
    %54 = vector.broadcast %cst_30 : f32 to vector<1x128xf32>
    %55 = arith.maximumf %53, %54 : vector<1x128xf32>
    %c1_31 = arith.constant 1 : index
    %c0_32 = arith.constant 0 : index
    %c0_33 = arith.constant 0 : index
    %56 = vector.load %arg5[%c1_31, %c0_32, %c0_33] : memref<2x1x128xf32, #tpu.memory_space<vmem>>, vector<1x1x128xf32>
    %57 = vector.shape_cast %56 : vector<1x1x128xf32> to vector<1x128xf32>
    %cst_34 = arith.constant 9.99999974E-6 : f32
    %58 = vector.broadcast %cst_34 : f32 to vector<1x128xf32>
    %59 = arith.addf %55, %58 : vector<1x128xf32>
    %60 = math.rsqrt %59 : vector<1x128xf32>
    %61 = arith.mulf %57, %60 : vector<1x128xf32>
    %c1_35 = arith.constant 1 : index
    %c0_36 = arith.constant 0 : index
    %c0_37 = arith.constant 0 : index
    %62 = vector.load %arg6[%c1_35, %c0_36, %c0_37] : memref<2x1x128xf32, #tpu.memory_space<vmem>>, vector<1x1x128xf32>
    %63 = vector.shape_cast %62 : vector<1x1x128xf32> to vector<1x128xf32>
    %64 = arith.mulf %46, %61 : vector<1x128xf32>
    %65 = arith.subf %63, %64 : vector<1x128xf32>
    %66 = vector.broadcast %61 : vector<1x128xf32> to vector<32x128xf32>
    %67 = arith.mulf %42, %66 : vector<32x128xf32>
    %68 = vector.broadcast %65 : vector<1x128xf32> to vector<32x128xf32>
    %69 = arith.addf %67, %68 : vector<32x128xf32>
    %cst_38 = arith.constant 0.000000e+00 : f32
    %70 = vector.broadcast %cst_38 : f32 to vector<32x128xf32>
    %71 = arith.maximumf %69, %70 : vector<32x128xf32>
    %c0_39 = arith.constant 0 : index
    %c0_40 = arith.constant 0 : index
    %72 = vector.load %arg7[%c0_39, %c0_40] : memref<32x128xf32, #tpu.memory_space<vmem>>, vector<32x128xf32>
    %73 = arith.addf %71, %72 : vector<32x128xf32>
    %cst_41 = arith.constant 0.000000e+00 : f32
    %74 = vector.broadcast %cst_41 : f32 to vector<32x128xf32>
    %75 = arith.maximumf %73, %74 : vector<32x128xf32>
    %c0_42 = arith.constant 0 : index
    %c0_43 = arith.constant 0 : index
    %76 = vector.load %arg8[%c0_42, %c0_43] : memref<128x128xf32, #tpu.memory_space<vmem>>, vector<128x128xf32>
    %cst_44 = arith.constant dense<0.000000e+00> : vector<32x128xf32>
    %77 = tpu.matmul %75, %76, %cst_44 {dimension_numbers = #tpu.dot_dimension_numbers<[1], [0], [0], [1], [0, 0, 1, 1], [], []>} : vector<32x128xf32>, vector<128x128xf32>, vector<32x128xf32> -> vector<32x128xf32>
    %c0_45 = arith.constant 0 : index
    %c0_46 = arith.constant 0 : index
    %78 = vector.load %arg9[%c0_45, %c0_46] : memref<1x128xf32, #tpu.memory_space<vmem>>, vector<1x128xf32>
    %79 = vector.broadcast %78 : vector<1x128xf32> to vector<32x128xf32>
    %80 = arith.addf %77, %79 : vector<32x128xf32>
    %c0_47 = arith.constant 0 : index
    %c0_48 = arith.constant 0 : index
    %81 = vector.load %arg10[%c0_47, %c0_48] : memref<32x128xf32, #tpu.memory_space<vmem>>, vector<32x128xf32>
    tpu.vector_store %arg10[%c0_47, %c0_48], %80 {strides = array<i32>} : memref<32x128xf32, #tpu.memory_space<vmem>>, vector<32x128xf32>,
    return
  }
  func.func @transform_0(%arg0: i32) -> (i32, i32) {
    %c0_i32 = arith.constant 0 : i32
    %c0_i32_0 = arith.constant 0 : i32
    %c0_i32_1 = arith.constant 0 : i32
    return %c0_i32, %c0_i32_0 : i32, i32
  }
  func.func @transform_1(%arg0: i32) -> (i32, i32) {
    %c0_i32 = arith.constant 0 : i32
    %c0_i32_0 = arith.constant 0 : i32
    %c0_i32_1 = arith.constant 0 : i32
    return %c0_i32, %c0_i32_0 : i32, i32
  }
  func.func @transform_2(%arg0: i32) -> (i32, i32) {
    %c0_i32 = arith.constant 0 : i32
    %c0_i32_0 = arith.constant 0 : i32
    %c0_i32_1 = arith.constant 0 : i32
    return %c0_i32, %c0_i32_0 : i32, i32
  }
  func.func @transform_3(%arg0: i32) -> (i32, i32, i32) {
    %c0_i32 = arith.constant 0 : i32
    %c0_i32_0 = arith.constant 0 : i32
    %c0_i32_1 = arith.constant 0 : i32
    %c0_i32_2 = arith.constant 0 : i32
    return %c0_i32, %c0_i32_0, %c0_i32_1 : i32, i32, i32
  }
  func.func @transform_4(%arg0: i32) -> (i32, i32, i32) {
    %c0_i32 = arith.constant 0 : i32
    %c0_i32_0 = arith.constant 0 : i32
    %c0_i32_1 = arith.constant 0 : i32
    %c0_i32_2 = arith.constant 0 : i32
    return %c0_i32, %c0_i32_0, %c0_i32_1 : i32, i32, i32
  }
  func.func @transform_5(%arg0: i32) -> (i32, i32, i32) {
    %c0_i32 = arith.constant 0 : i32
    %c0_i32_0 = arith.constant 0 : i32
    %c0_i32_1 = arith.constant 0 : i32
    %c0_i32_2 = arith.constant 0 : i32
    return %c0_i32, %c0_i32_0, %c0_i32_1 : i32, i32, i32
  }
  func.func @transform_6(%arg0: i32) -> (i32, i32) {
    %c0_i32 = arith.constant 0 : i32
    %c0_i32_0 = arith.constant 0 : i32
    %c0_i32_1 = arith.constant 0 : i32
    return %c0_i32, %c0_i32_0 : i32, i32
  }
  func.func @transform_7(%arg0: i32) -> (i32, i32) {
    %c0_i32 = arith.constant 0 : i32
    %c0_i32_0 = arith.constant 0 : i32
    %c0_i32_1 = arith.constant 0 : i32
    return %c0_i32, %c0_i32_0 : i32, i32
  }
  func.func @transform_8(%arg0: i32) -> (i32, i32) {
    %c0_i32 = arith.constant 0 : i32
    %c0_i32_0 = arith.constant 0 : i32
    %c0_i32_1 = arith.constant 0 : i32
    return %c0_i32, %c0_i32_0 : i32, i32
  }
  func.func @transform_9(%arg0: i32) -> (i32, i32) {
    %c0_i32 = arith.constant 0 : i32
    %c0_i32_0 = arith.constant 0 : i32
    %c0_i32_1 = arith.constant 0 : i32
    return %c0_i32, %c0_i32_0 : i32, i32
  }
}

</mosaic_0001>

<bundles_post_ra>
// kernel: tpu_custom_call.1
= control target key start
LH: loop header
LB: loop body
LE: loop exit
PB: predicated region body
PF: predicated region fallthrough
CT: control target
= control target key end

     0   :  { %14 = vsyncpa [#allocation3], 0  ;;  %s857_s0 = inlined_call_operand.hbm [shape: f32[32,128], index: 0, kind: input, shape index: {}]   ;;  %s858_s1 = inlined_call_operand.hbm [shape: f32[128,128], index: 1, kind: input, shape index: {}]   ;;  %s859_s2 = inlined_call_operand.hbm [shape: f32[1,128], index: 2, kind: input, shape index: {}]   ;;  %s860_s3 = inlined_call_operand.hbm [shape: f32[2,128,128], index: 3, kind: input, shape index: {}]   ;;  %s861_s4 = inlined_call_operand.vmem [shape: f32[2,1,128], index: 4, kind: input, shape index: {}]   ;;  %s862_s5 = inlined_call_operand.vmem [shape: f32[2,1,128], index: 5, kind: input, shape index: {}]   ;;  %s863_s6 = inlined_call_operand.hbm [shape: f32[32,128], index: 6, kind: input, shape index: {}]   ;;  %s864_s7 = inlined_call_operand.hbm [shape: f32[128,128], index: 7, kind: input, shape index: {}]   ;;  %s865_s8 = inlined_call_operand.vmem [shape: f32[1,128], index: 8, kind: input, shape index: {}]   ;;  %s866_s9 = inlined_call_operand.hbm [shape: f32[32,128], index: 9, kind: output, shape index: {}]  }
   0x1   :  { %15 = vsyncpa [#allocation6], 0 }
   0x2   :  { %16 = vsyncpa [#allocation9], 0 }
   0x3   :  { %17 = vsyncpa [#allocation12], 0 }
   0x4   :  { %18 = vsyncpa [#allocation4], 0  ;;  %s36_s11 = sshll.u32 %s858_s1, 4  ;;  %s689_s12 = smov [#allocation5]   ;;  %s37_s11 = int_to_ptr.hbm [resolvable:$true] %s36_s11 }
   0x5   :  { %s38_s13 = sshll.u32 %s689_s12, 4  ;;  %s60_s16 = sshll.u32 %s860_s3, 4  ;;  %s39_s13 = int_to_ptr.vmem [resolvable:$true] %s38_s13  ;;  %s61_s16 = int_to_ptr.hbm [resolvable:$true] %s60_s16 }
   0x6   :  { %s690_s17 = smov 128   ;;  %s691_s18 = smov 8  }
   0x7   :  { %44 = dma.hbm_to_vmem [thread:$0]  %s37_s11, 2048, %s39_s13, [#allocation6], %s690_s17, %s690_s17, %s691_s18  }
   0x8   :  { %s692_s19 = smov [#allocation8]   ;;  %s23_s1 = sshll.u32 %s857_s0, 4  ;;  %s24_s1 = int_to_ptr.hbm [resolvable:$true] %s23_s1 }
   0x9   :  { %s62_s20 = sshll.u32 %s692_s19, 4  ;;  %s50_s24 = sshll.u32 %s859_s2, 4  ;;  %s63_s20 = int_to_ptr.vmem [resolvable:$true] %s62_s20  ;;  %s51_s24 = int_to_ptr.hbm [resolvable:$true] %s50_s24 }
   0xa   :  { %68 = dma.hbm_to_vmem [thread:$0]  %s61_s16, 4096, %s63_s20, [#allocation9], %s690_s17, %s690_s17, %s691_s18  }
   0xb   :  { %s693_s25 = smov [#allocation2]   ;;  %s694_s27 = smov [#allocation7]  }
   0xc   :  { %s25_s26 = sshll.u32 %s693_s25, 4  ;;  %s52_s0 = sshll.u32 %s694_s27, 4  ;;  %s26_s26 = int_to_ptr.vmem [resolvable:$true] %s25_s26  ;;  %s53_s0 = int_to_ptr.vmem [resolvable:$true] %s52_s0 }
   0xd   :  { %31 = dma.hbm_to_vmem [thread:$0]  %s24_s1, 512, %s26_s26, [#allocation3], %s690_s17, %s690_s17, %s691_s18  }
   0xe   :  { %s77_s30 = sshll.u32 %s863_s6, 4  ;;  %s90_s2 = sshll.u32 %s864_s7, 4  ;;  %s78_s30 = int_to_ptr.hbm [resolvable:$true] %s77_s30  ;;  %s91_s2 = int_to_ptr.hbm [resolvable:$true] %s90_s2 }
   0xf   :  { %55 = dma.hbm_to_vmem [thread:$0]  %s51_s24, 16, %s53_s0, [#allocation6]  }
  0x10   :  { %s695_s12 = smov [#allocation10]   ;;  %s696_s14 = smov [#allocation11]  }
  0x11   :  { %s79_s13 = sshll.u32 %s695_s12, 4  ;;  %s92_s15 = sshll.u32 %s696_s14, 4  ;;  %s80_s13 = int_to_ptr.vmem [resolvable:$true] %s79_s13  ;;  %s93_s15 = int_to_ptr.vmem [resolvable:$true] %s92_s15 }
  0x12   :  { %85 = dma.hbm_to_vmem [thread:$0]  %s78_s30, 512, %s80_s13, [#allocation9], %s690_s17, %s690_s17, %s691_s18  }
  0x13   :  { %98 = dma.hbm_to_vmem [thread:$0]  %s91_s2, 2048, %s93_s15, [#allocation12], %s690_s17, %s690_s17, %s691_s18  }
  0x14   :  { %679 = dma.done.wait [#allocation3], 512  }
  0x15   :  { %680 = vsyncadd [#allocation3], 4294966784 }
  0x16   :  { %681 = dma.done.wait [#allocation6], 2064  }
  0x17   :  { %682 = vsyncadd [#allocation6], 4294965232 }
  0x18   :  { %683 = dma.done.wait [#allocation9], 4608  }
  0x19   :  { %684 = vsyncadd [#allocation9], 4294962688 }
  0x1a   :  { %685 = dma.done.wait [#allocation12], 2048  }
  0x1b   :  { %686 = vsyncadd [#allocation12], 4294965248  ;;  %v144_v0 = vld [vmem:[#allocation5 + $0x78] sm:$0xff]  ;;  %v143_v1 = vld [vmem:[#allocation5 + $0x70] sm:$0xff]  ;;  %v697_v51 = vmov 32.0   ;;  %s698_s3 = smov [#allocation13]  }
  0x1c   :  { %149 = vmatpush.msra.mxu0 %v144_v0  ;;  %v142_v2 = vld [vmem:[#allocation5 + $0x68] sm:$0xff]  ;;  %v141_v3 = vld [vmem:[#allocation5 + $0x60] sm:$0xff]  ;;  %v140_v4 = vld [vmem:[#allocation5 + $0x58] sm:$0xff]  ;;  %505 = vrcp.f32 %v697_v51  ;;  %s473_s23 = sshll.u32 %s698_s3, 4  ;;  %s475_s26 = sshll.u32 %s866_s9, 4  ;;  %s474_s23 = int_to_ptr.vmem [resolvable:$true] %s473_s23  ;;  %s476_s26 = int_to_ptr.hbm [resolvable:$true] %s475_s26 }
  0x1d   :  { %v139_v5 = vld [vmem:[#allocation5 + $0x50] sm:$0xff]  ;;  %v138_v6 = vld [vmem:[#allocation5 + $0x48] sm:$0xff]  ;;  %v137_v7 = vld [vmem:[#allocation5 + $0x40] sm:$0xff] }
  0x1e   :  { %150 = vmatpush.msra.mxu0 %v143_v1  ;;  %v136_v8 = vld [vmem:[#allocation5 + $0x38] sm:$0xff]  ;;  %v135_v9 = vld [vmem:[#allocation5 + $0x30] sm:$0xff]  ;;  %v134_v10 = vld [vmem:[#allocation5 + $0x28] sm:$0xff] }
  0x1f   :  { %v133_v11 = vld [vmem:[#allocation5 + $0x20] sm:$0xff]  ;;  %v132_v12 = vld [vmem:[#allocation5 + $0x18] sm:$0xff]  ;;  %v131_v13 = vld [vmem:[#allocation5 + $0x10] sm:$0xff] }
  0x20   :  { %151 = vmatpush.msra.mxu0 %v142_v2  ;;  %v197_v14 = vld [vmem:[#allocation8 + $0x78] sm:$0xff]  ;;  %v196_v15 = vld [vmem:[#allocation8 + $0x70] sm:$0xff]  ;;  %v130_v16 = vld [vmem:[#allocation5 + $0x8] sm:$0xff] }
  0x21   :  { %198 = vmatpush.msra.mxu1 %v197_v14  ;;  %v195_v17 = vld [vmem:[#allocation8 + $0x68] sm:$0xff]  ;;  %v129_v18 = vld [vmem:[#allocation5] sm:$0xff]  ;;  %v192_v22 = vld [vmem:[#allocation8 + $0x50] sm:$0xff] }
  0x22   :  { %152 = vmatpush.msra.mxu0 %v141_v3  ;;  %v194_v19 = vld [vmem:[#allocation8 + $0x60] sm:$0xff]  ;;  %v193_v21 = vld [vmem:[#allocation8 + $0x58] sm:$0xff]  ;;  %v191_v23 = vld [vmem:[#allocation8 + $0x48] sm:$0xff]  ;;  %v506_v54 = vpop.eup %505 }
  0x23   :  { %199 = vmatpush.msra.mxu1 %v196_v15  ;;  %v125_v20 = vld [vmem:[#allocation2] sm:$0xff]  ;;  %v126_v25 = vld [vmem:[#allocation2 + $0x8] sm:$0xff]  ;;  %v188_v27 = vld [vmem:[#allocation8 + $0x30] sm:$0xff]  ;;  %v237_v58 = vmul.f32 32.0, %v506_v54  ;;  %vm241_vm0 = vweird.f32 %v506_v54 }
  0x24   :  { %153 = vmatpush.msra.mxu0 %v140_v4  ;;  %v190_v24 = vld [vmem:[#allocation8 + $0x40] sm:$0xff]  ;;  %v189_v26 = vld [vmem:[#allocation8 + $0x38] sm:$0xff]  ;;  %v187_v28 = vld [vmem:[#allocation8 + $0x28] sm:$0xff] }
  0x25   :  { %200 = vmatpush.msra.mxu1 %v195_v17  ;;  %v186_v29 = vld [vmem:[#allocation8 + $0x20] sm:$0xff]  ;;  %v127_v30 = vld [vmem:[#allocation2 + $0x10] sm:$0xff]  ;;  %v185_v31 = vld [vmem:[#allocation8 + $0x18] sm:$0xff]  ;;  %v238_v3 = vsub.f32 1.0, %v237_v58 }
  0x26   :  { %154 = vmatpush.msra.mxu0 %v139_v5  ;;  %v128_v32 = vld [vmem:[#allocation2 + $0x18] sm:$0xff]  ;;  %v183_v34 = vld [vmem:[#allocation8 + $0x8] sm:$0xff]  ;;  %v182_v35 = vld [vmem:[#allocation8] sm:$0xff] }
  0x27   :  { %201 = vmatpush.msra.mxu1 %v194_v19  ;;  %v184_v33 = vld [vmem:[#allocation8 + $0x10] sm:$0xff]  ;;  %v503_v36 = vld [vmem:[#allocation7] ss:$0 sm:$0xff]  ;;  %v309_v57 = vld [vmem:[#allocation8 + $0xe8] sm:$0xff] }
  0x28   :  { %155 = vmatpush.msra.mxu0 %v138_v6  ;;  %v311_v52 = vld [vmem:[#allocation8 + $0xf8] sm:$0xff]  ;;  %v310_v55 = vld [vmem:[#allocation8 + $0xf0] sm:$0xff]  ;;  %v308_v62 = vld [vmem:[#allocation8 + $0xe0] sm:$0xff] }
  0x29   :  { %202 = vmatpush.msra.mxu1 %v193_v21  ;;  %312 = vmatpush.msra.mxu2 %v311_v52  ;;  %v307_v1 = vld [vmem:[#allocation8 + $0xd8] sm:$0xff]  ;;  %v304_v14 = vld [vmem:[#allocation8 + $0xc0] sm:$0xff]  ;;  %v302_v21 = vld [vmem:[#allocation8 + $0xb0] sm:$0xff] }
  0x2a   :  { %156 = vmatpush.msra.mxu0 %v137_v7  ;;  %v306_v7 = vld [vmem:[#allocation8 + $0xd0] sm:$0xff]  ;;  %v303_v17 = vld [vmem:[#allocation8 + $0xb8] sm:$0xff] }
  0x2b   :  { %203 = vmatpush.msra.mxu1 %v192_v22  ;;  %313 = vmatpush.msra.mxu2 %v310_v55  ;;  %v274_v51 = vld [vmem:[%s862_s5] sm:$0x1] }
  0x2c   :  { %157 = vmatpush.msra.mxu0 %v136_v8 }
  0x2d   :  { %204 = vmatpush.msra.mxu1 %v191_v23  ;;  %314 = vmatpush.msra.mxu2 %v309_v57 }
  0x2e   :  { %158 = vmatpush.msra.mxu0 %v135_v9 }
  0x2f   :  { %205 = vmatpush.msra.mxu1 %v190_v24  ;;  %315 = vmatpush.msra.mxu2 %v308_v62  ;;  %v301_v24 = vld [vmem:[#allocation8 + $0xa8] sm:$0xff] }
  0x30   :  { %159 = vmatpush.msra.mxu0 %v134_v10  ;;  %v305_v10 = vld [vmem:[#allocation8 + $0xc8] sm:$0xff] }
  0x31   :  { %206 = vmatpush.msra.mxu1 %v189_v26  ;;  %316 = vmatpush.msra.mxu2 %v307_v1 }
  0x32   :  { %160 = vmatpush.msra.mxu0 %v133_v11  ;;  %v239_v11 = vmul.f32 %v506_v54, %v238_v3 }
  0x33   :  { %207 = vmatpush.msra.mxu1 %v188_v27  ;;  %317 = vmatpush.msra.mxu2 %v306_v7 }
  0x34   :  { %161 = vmatpush.msra.mxu0 %v132_v12 }
  0x35   :  { %208 = vmatpush.msra.mxu1 %v187_v28  ;;  %318 = vmatpush.msra.mxu2 %v305_v10  ;;  %v300_v28 = vld [vmem:[#allocation8 + $0xa0] sm:$0xff]  ;;  %v430_v10 = vld [vmem:[#allocation11 + $0x70] sm:$0xff] }
  0x36   :  { %162 = vmatpush.msra.mxu0 %v131_v13 }
  0x37   :  { %209 = vmatpush.msra.mxu1 %v186_v29  ;;  %319 = vmatpush.msra.mxu2 %v304_v14  ;;  %v429_v14 = vld [vmem:[#allocation11 + $0x68] sm:$0xff] }
  0x38   :  { %163 = vmatpush.msra.mxu0 %v130_v16 }
  0x39   :  { %210 = vmatpush.msra.mxu1 %v185_v31  ;;  %320 = vmatpush.msra.mxu2 %v303_v17  ;;  %v299_v31 = vld [vmem:[#allocation8 + $0x98] sm:$0xff] }
  0x3a   :  { %164 = vmatpush.msra.mxu0 %v129_v18  ;;  %v240_v18 = vadd.f32 %v506_v54, %v239_v11 }
  0x3b   :  { %165 = vmatmul.f32.vlgmr.msra.gmra.mxu0 %v125_v20  ;;  %211 = vmatpush.msra.mxu1 %v184_v33 }
  0x3c   :  { %321 = vmatpush.msra.mxu2 %v302_v21  ;;  %v427_v21 = vld [vmem:[#allocation11 + $0x58] sm:$0xff] }
  0x3d   :  { %212 = vmatpush.msra.mxu1 %v183_v34 }
  0x3e   :  { %322 = vmatpush.msra.mxu2 %v301_v24  ;;  %v426_v24 = vld [vmem:[#allocation11 + $0x50] sm:$0xff] }
  0x3f   :  { %213 = vmatpush.msra.mxu1 %v182_v35  ;;  %v297_v35 = vld [vmem:[#allocation8 + $0x88] sm:$0xff] }
  0x40   :  { %323 = vmatpush.msra.mxu2 %v300_v28  ;;  %v425_v28 = vld [vmem:[#allocation11 + $0x48] sm:$0xff] }
  0x42   :  { %324 = vmatpush.msra.mxu2 %v299_v31  ;;  %v424_v31 = vld [vmem:[#allocation11 + $0x40] sm:$0xff] }
  0x43   :  { %168 = vmatmul.f32.gmra.mxu0 %v126_v25  ;;  %v802_v25 = vsel %vm241_vm0, %v506_v54, %v240_v18  ;;  %v428_v18 = vld [vmem:[#allocation11 + $0x60] sm:$0xff] }
  0x4b   :  { %171 = vmatmul.f32.gmra.mxu0 %v127_v30 }
  0x53   :  { %174 = vmatmul.f32.gmra.mxu0 %v128_v32  ;;  %v298_v32 = vld [vmem:[#allocation8 + $0x90] sm:$0xff] }
  0x54   :  { %325 = vmatpush.msra.mxu2 %v298_v32 }
  0x56   :  { %326 = vmatpush.msra.mxu2 %v297_v35 }
  0xb8   :  { %v166_v37 = vpop.f32.mrf.mxu0 }
  0xb9   :  { %v167_v38 = vadd.f32 %v503_v36, %v166_v37  ;;  %v296_v37 = vld [vmem:[#allocation8 + $0x80] sm:$0xff] }
  0xba   :  { %327 = vmatpush.msra.mxu2 %v296_v37  ;;  %v422_v37 = vld [vmem:[#allocation11 + $0x30] sm:$0xff] }
  0xbb   :  { %v178_v39 = vmax.f32 %v167_v38, 0.0 }
  0xbd   :  { %214 = vmatmul.f32.vlgmr.msra.gmra.mxu1 %v178_v39 }
  0xc0   :  { %v169_v40 = vpop.f32.mrf.mxu0 }
  0xc1   :  { %v170_v41 = vadd.f32 %v503_v36, %v169_v40 }
  0xc3   :  { %v179_v42 = vmax.f32 %v170_v41, 0.0 }
  0xc5   :  { %217 = vmatmul.f32.gmra.mxu1 %v179_v42 }
  0xc8   :  { %v172_v43 = vpop.f32.mrf.mxu0 }
  0xc9   :  { %v173_v44 = vadd.f32 %v503_v36, %v172_v43 }
  0xcb   :  { %v180_v45 = vmax.f32 %v173_v44, 0.0 }
  0xcd   :  { %220 = vmatmul.f32.gmra.mxu1 %v180_v45  ;;  %v261_v45 = vld [vmem:[%s861_s4] sm:$0x1] }
  0xd0   :  { %v175_v46 = vpop.f32.mrf.mxu0 }
  0xd1   :  { %v176_v47 = vadd.f32 %v503_v36, %v175_v46 }
  0xd3   :  { %v181_v48 = vmax.f32 %v176_v47, 0.0 }
  0xd5   :  { %223 = vmatmul.f32.gmra.mxu1 %v181_v48 }
 0x13a   :  { %v782_v49 = vpop.f32.mrf.mxu1 }
 0x13b   :  { %v244_v59 = vmul.f32 %v782_v49, %v782_v49 }
 0x142   :  { %v784_v50 = vpop.f32.mrf.mxu1 }
 0x143   :  { %v245_v56 = vmul.f32 %v784_v50, %v784_v50  ;;  %v227_v60 = vadd.f32 %v784_v50, %v782_v49 }
 0x145   :  { %v248_v63 = vadd.f32 %v245_v56, %v244_v59 }
 0x14a   :  { %v786_v53 = vpop.f32.mrf.mxu1 }
 0x14b   :  { %v246_v61 = vmul.f32 %v786_v53, %v786_v53  ;;  %v228_v0 = vadd.f32 %v227_v60, %v786_v53 }
 0x14d   :  { %v249_v4 = vadd.f32 %v248_v63, %v246_v61 }
 0x152   :  { %v797_v2 = vpop.f32.mrf.mxu1 }
 0x153   :  { %v229_v5 = vadd.f32 %v228_v0, %v797_v2  ;;  %v247_v6 = vmul.f32 %v797_v2, %v797_v2 }
 0x155   :  { %v230_v8 = vrot.slane %v229_v5, 4  ;;  %v250_v9 = vadd.f32 %v249_v4, %v247_v6 }
 0x157   :  { %v231_v12 = vadd.f32 %v230_v8, %v229_v5  ;;  %v251_v13 = vrot.slane %v250_v9, 4  ;;  %v431_v8 = vld [vmem:[#allocation11 + $0x78] sm:$0xff] }
 0x158   :  { %436 = vmatpush.msra.mxu3 %v431_v8  ;;  %v404_v8 = vld [vmem:[#allocation10] sm:$0xff] }
 0x159   :  { %v232_v15 = vrot.slane %v231_v12, 2  ;;  %v252_v16 = vadd.f32 %v251_v13, %v250_v9 }
 0x15a   :  { %437 = vmatpush.msra.mxu3 %v430_v10 }
 0x15b   :  { %v233_v19 = vadd.f32 %v232_v15, %v231_v12  ;;  %v253_v20 = vrot.slane %v252_v16, 2 }
 0x15c   :  { %438 = vmatpush.msra.mxu3 %v429_v14 }
 0x15d   :  { %v234_v22 = vrot.slane %v233_v19, 1  ;;  %v254_v23 = vadd.f32 %v253_v20, %v252_v16 }
 0x15e   :  { %439 = vmatpush.msra.mxu3 %v428_v18 }
 0x15f   :  { %v235_v26 = vadd.f32 %v234_v22, %v233_v19  ;;  %v255_v27 = vrot.slane %v254_v23, 1 }
 0x160   :  { %440 = vmatpush.msra.mxu3 %v427_v21 }
 0x161   :  { %v243_v29 = vmul.f32 %v802_v25, %v235_v26  ;;  %v256_v30 = vadd.f32 %v255_v27, %v254_v23 }
 0x162   :  { %441 = vmatpush.msra.mxu3 %v426_v24 }
 0x163   :  { %v257_v33 = vmul.f32 %v256_v30, %v802_v25  ;;  %v258_v34 = vmul.f32 %v243_v29, %v243_v29 }
 0x164   :  { %442 = vmatpush.msra.mxu3 %v425_v28 }
 0x165   :  { %v259_v36 = vsub.f32 %v257_v33, %v258_v34  ;;  %v423_v34 = vld [vmem:[#allocation11 + $0x38] sm:$0xff] }
 0x166   :  { %443 = vmatpush.msra.mxu3 %v424_v31 }
 0x167   :  { %v260_v38 = vmax.f32 %v259_v36, 0.0 }
 0x168   :  { %444 = vmatpush.msra.mxu3 %v423_v34 }
 0x169   :  { %v262_v39 = vadd.f32 1e-05, %v260_v38 }
 0x16a   :  { %445 = vmatpush.msra.mxu3 %v422_v37 }
 0x16b   :  { %507 = vrsqrt.f32 %v262_v39  ;;  %vm269_vm2 = vweird.f32 %v262_v39 }
 0x171   :  { %v508_v40 = vpop.eup %507 }
 0x172   :  { %v264_v41 = vmul.f32 %v508_v40, %v262_v39  ;;  %vm270_vm1 = vweird.f32 %v508_v40 }
 0x173   :  { %vm271_vm3 = vmor %vm269_vm2, %vm270_vm1 }
 0x174   :  { %v265_v42 = vmul.f32 %v508_v40, %v264_v41 }
 0x176   :  { %v266_v43 = vmul.f32 0.5, %v265_v42 }
 0x178   :  { %v267_v44 = vsub.f32 1.5, %v266_v43  ;;  %v420_v43 = vld [vmem:[#allocation11 + $0x20] sm:$0xff] }
 0x17a   :  { %v268_v46 = vmul.f32 %v508_v40, %v267_v44 }
 0x17c   :  { %v272_v47 = vsel %vm271_vm3, %v508_v40, %v268_v46  ;;  %v421_v40 = vld [vmem:[#allocation11 + $0x28] sm:$0xff]  ;;  %v418_v46 = vld [vmem:[#allocation11 + $0x10] sm:$0xff] }
 0x17d   :  { %v273_v48 = vmul.f32 %v272_v47, %v261_v45  ;;  %446 = vmatpush.msra.mxu3 %v421_v40  ;;  %v419_v45 = vld [vmem:[#allocation11 + $0x18] sm:$0xff] }
 0x17f   :  { %v275_v52 = vmul.f32 %v273_v48, %v243_v29  ;;  %v278_v54 = vperm.slane %v273_v48, 0  ;;  %447 = vmatpush.msra.mxu3 %v420_v43  ;;  %v417_v48 = vld [vmem:[#allocation11 + $0x8] sm:$0xff] }
 0x181   :  { %v276_v55 = vsub.f32 %v274_v51, %v275_v52  ;;  %v280_v56 = vmul.f32 %v278_v54, %v782_v49  ;;  %v281_v60 = vmul.f32 %v278_v54, %v784_v50  ;;  %v282_v63 = vmul.f32 %v278_v54, %v786_v53  ;;  %448 = vmatpush.msra.mxu3 %v419_v45  ;;  %v416_v52 = vld [vmem:[#allocation11] sm:$0xff] }
 0x182   :  { %v283_v3 = vmul.f32 %v278_v54, %v797_v2 }
 0x183   :  { %v285_v57 = vperm.slane %v276_v55, 0  ;;  %449 = vmatpush.msra.mxu3 %v418_v46 }
 0x185   :  { %v287_v58 = vadd.f32 %v285_v57, %v280_v56  ;;  %v288_v61 = vadd.f32 %v285_v57, %v281_v60  ;;  %v289_v0 = vadd.f32 %v285_v57, %v282_v63  ;;  %v290_v4 = vadd.f32 %v285_v57, %v283_v3  ;;  %450 = vmatpush.msra.mxu3 %v417_v48 }
 0x187   :  { %v291_v59 = vmax.f32 %v287_v58, 0.0  ;;  %v292_v62 = vmax.f32 %v288_v61, 0.0  ;;  %v293_v1 = vmax.f32 %v289_v0, 0.0  ;;  %v294_v5 = vmax.f32 %v290_v4, 0.0  ;;  %451 = vmatpush.msra.mxu3 %v416_v52  ;;  %v491_v58 = vld [vmem:[%s861_s4 + $0x1] sm:$0x1] }
 0x189   :  { %328 = vmatmul.f32.vlgmr.msra.gmra.mxu2 %v291_v59 }
 0x191   :  { %331 = vmatmul.f32.gmra.mxu2 %v292_v62  ;;  %v492_v62 = vld [vmem:[%s862_s5 + $0x1] sm:$0x1] }
 0x199   :  { %334 = vmatmul.f32.gmra.mxu2 %v293_v1 }
 0x1a1   :  { %337 = vmatmul.f32.gmra.mxu2 %v294_v5 }
 0x20c   :  { %v816_v49 = vpop.f32.mrf.mxu2 }
 0x20d   :  { %v351_v53 = vmul.f32 %v816_v49, %v816_v49 }
 0x214   :  { %v818_v6 = vpop.f32.mrf.mxu2 }
 0x215   :  { %v352_v50 = vmul.f32 %v818_v6, %v818_v6  ;;  %v341_v2 = vadd.f32 %v818_v6, %v816_v49 }
 0x217   :  { %v355_v11 = vadd.f32 %v352_v50, %v351_v53 }
 0x21c   :  { %v820_v7 = vpop.f32.mrf.mxu2 }
 0x21d   :  { %v353_v9 = vmul.f32 %v820_v7, %v820_v7  ;;  %v342_v12 = vadd.f32 %v341_v2, %v820_v7 }
 0x21f   :  { %v356_v15 = vadd.f32 %v355_v11, %v353_v9 }
 0x224   :  { %v831_v13 = vpop.f32.mrf.mxu2 }
 0x225   :  { %v343_v16 = vadd.f32 %v342_v12, %v831_v13  ;;  %v354_v17 = vmul.f32 %v831_v13, %v831_v13  ;;  %v405_v12 = vld [vmem:[#allocation10 + $0x8] sm:$0xff] }
 0x227   :  { %v344_v19 = vrot.slane %v343_v16, 4  ;;  %v357_v20 = vadd.f32 %v356_v15, %v354_v17 }
 0x229   :  { %v345_v22 = vadd.f32 %v344_v19, %v343_v16  ;;  %v358_v23 = vrot.slane %v357_v20, 4  ;;  %v406_v19 = vld [vmem:[#allocation10 + $0x10] sm:$0xff] }
 0x22b   :  { %v346_v26 = vrot.slane %v345_v22, 2  ;;  %v359_v27 = vadd.f32 %v358_v23, %v357_v20  ;;  %v407_v23 = vld [vmem:[#allocation10 + $0x18] sm:$0xff] }
 0x22d   :  { %v347_v29 = vadd.f32 %v346_v26, %v345_v22  ;;  %v360_v30 = vrot.slane %v359_v27, 2 }
 0x22f   :  { %v348_v32 = vrot.slane %v347_v29, 1  ;;  %v361_v33 = vadd.f32 %v360_v30, %v359_v27 }
 0x231   :  { %v349_v35 = vadd.f32 %v348_v32, %v347_v29  ;;  %v362_v36 = vrot.slane %v361_v33, 1 }
 0x233   :  { %v350_v38 = vmul.f32 %v349_v35, %v802_v25  ;;  %v363_v39 = vadd.f32 %v362_v36, %v361_v33 }
 0x235   :  { %v364_v41 = vmul.f32 %v363_v39, %v802_v25  ;;  %v365_v42 = vmul.f32 %v350_v38, %v350_v38 }
 0x237   :  { %v366_v44 = vsub.f32 %v364_v41, %v365_v42 }
 0x239   :  { %v367_v47 = vmax.f32 %v366_v44, 0.0 }
 0x23b   :  { %v370_v51 = vadd.f32 1e-05, %v367_v47 }
 0x23d   :  { %509 = vrsqrt.f32 %v370_v51  ;;  %vm377_vm5 = vweird.f32 %v370_v51 }
 0x243   :  { %v510_v54 = vpop.eup %509 }
 0x244   :  { %v372_v55 = vmul.f32 %v510_v54, %v370_v51  ;;  %vm378_vm4 = vweird.f32 %v510_v54 }
 0x245   :  { %vm379_vm6 = vmor %vm377_vm5, %vm378_vm4 }
 0x246   :  { %v373_v56 = vmul.f32 %v510_v54, %v372_v55 }
 0x248   :  { %v374_v25 = vmul.f32 0.5, %v373_v56 }
 0x24a   :  { %v375_v57 = vsub.f32 1.5, %v374_v25 }
 0x24c   :  { %v376_v59 = vmul.f32 %v510_v54, %v375_v57 }
 0x24e   :  { %v380_v60 = vsel %vm379_vm6, %v510_v54, %v376_v59 }
 0x24f   :  { %v381_v61 = vmul.f32 %v491_v58, %v380_v60 }
 0x251   :  { %v384_v63 = vmul.f32 %v381_v61, %v350_v38  ;;  %v387_v0 = vperm.slane %v381_v61, 0 }
 0x253   :  { %v385_v1 = vsub.f32 %v492_v62, %v384_v63  ;;  %v389_v4 = vmul.f32 %v387_v0, %v816_v49  ;;  %v390_v50 = vmul.f32 %v387_v0, %v818_v6  ;;  %v391_v14 = vmul.f32 %v387_v0, %v820_v7  ;;  %v504_v7 = vld [vmem:[%s865_s8] ss:$0 sm:$0xff] }
 0x254   :  { %v392_v49 = vmul.f32 %v387_v0, %v831_v13 }
 0x255   :  { %v394_v3 = vperm.slane %v385_v1, 0 }
 0x257   :  { %v396_v5 = vadd.f32 %v394_v3, %v389_v4  ;;  %v397_v2 = vadd.f32 %v394_v3, %v390_v50  ;;  %v398_v16 = vadd.f32 %v394_v3, %v391_v14  ;;  %v399_v20 = vadd.f32 %v394_v3, %v392_v49 }
 0x259   :  { %v400_v53 = vmax.f32 %v396_v5, 0.0  ;;  %v401_v11 = vmax.f32 %v397_v2, 0.0  ;;  %v402_v18 = vmax.f32 %v398_v16, 0.0  ;;  %v403_v22 = vmax.f32 %v399_v20, 0.0 }
 0x25b   :  { %v408_v9 = vadd.f32 %v404_v8, %v400_v53  ;;  %v409_v15 = vadd.f32 %v405_v12, %v401_v11  ;;  %v410_v6 = vadd.f32 %v406_v19, %v402_v18  ;;  %v411_v24 = vadd.f32 %v407_v23, %v403_v22 }
 0x25d   :  { %v412_v10 = vmax.f32 %v408_v9, 0.0  ;;  %v413_v17 = vmax.f32 %v409_v15, 0.0  ;;  %v414_v21 = vmax.f32 %v410_v6, 0.0  ;;  %v415_v26 = vmax.f32 %v411_v24, 0.0 }
 0x25f   :  { %452 = vmatmul.f32.vlgmr.msra.gmra.mxu3 %v412_v10 }
 0x267   :  { %455 = vmatmul.f32.gmra.mxu3 %v413_v17 }
 0x26f   :  { %458 = vmatmul.f32.gmra.mxu3 %v414_v21 }
 0x277   :  { %461 = vmatmul.f32.gmra.mxu3 %v415_v26 }
 0x2e2   :  { %v453_v27 = vpop.f32.mrf.mxu3 }
 0x2e3   :  { %v454_v28 = vadd.f32 %v504_v7, %v453_v27 }
 0x2e5   :  { %465 = vst [vmem:[#allocation13] sm:$0xff] %v454_v28 }
 0x2ea   :  { %v456_v29 = vpop.f32.mrf.mxu3 }
 0x2eb   :  { %v457_v30 = vadd.f32 %v504_v7, %v456_v29 }
 0x2ed   :  { %466 = vst [vmem:[#allocation13 + $0x8] sm:$0xff] %v457_v30 }
 0x2f2   :  { %v459_v13 = vpop.f32.mrf.mxu3 }
 0x2f3   :  { %v460_v31 = vadd.f32 %v504_v7, %v459_v13 }
 0x2f5   :  { %467 = vst [vmem:[#allocation13 + $0x10] sm:$0xff] %v460_v31 }
 0x2fa   :  { %v462_v32 = vpop.f32.mrf.mxu3 }
 0x2fb   :  { %v463_v33 = vadd.f32 %v504_v7, %v462_v32 }
 0x2fd   :  { %468 = vst [vmem:[#allocation13 + $0x18] sm:$0xff] %v463_v33 }
 0x2fe   :  { %481 = dma.vmem_to_hbm [thread:$0]  %s474_s23, 512, %s476_s26, [#allocation4], %s690_s17, %s690_s17, %s691_s18  }
 0x2ff   :  { %687 = dma.done.wait [#allocation4], 512  }
 0x300   :  { %688 = vsyncadd [#allocation4], 4294966784 }
 0x301   :  { %486 = vsyncpa [#allocation3], 1 }
 0x302   :  { %487 = vsyncpa [#allocation6], 1 }
 0x303   :  { %488 = vsyncpa [#allocation9], 1 }
 0x304   :  { %489 = vsyncpa [#allocation12], 1 }
 0x305   :  { %490 = vsyncpa [#allocation4], 1 }

</bundles_post_ra>
